<compile_context>
chip_gen: v7x
topology: tpu7x:2x2x1
jax: 0.10.0
libtpu: 0.0.40
codegen_flags: <defaults>
</compile_context>

<pallas_src>
import functools

import jax
import jax.numpy as jnp
from jax import lax
from jax.experimental import pallas as pl
from jax.experimental.pallas import tpu as pltpu

EPS = 1e-5  # nn.BatchNorm3d default eps


def _conv_stats_kernel(w_ref, x_ref, y_ref, stats_ref):
    """One M-tile: fused K=27*Cin MXU matmul + per-tile partial BN statistics.

    w_ref:     (Cout, K)        resident weights (K = 27*Cin)
    x_ref:     (K, TILE_M)      im2col tile (lanes = flattened spatial rows)
    y_ref:     (Cout, TILE_M)   conv output tile (f32)
    stats_ref: (1, Cout, 2)     per-tile [sum, sum_of_squares] per channel
    """
    y = jnp.dot(w_ref[...], x_ref[...], preferred_element_type=jnp.float32)
    y_ref[...] = y
    s = jnp.sum(y, axis=1, keepdims=True)        # (Cout, 1)
    ss = jnp.sum(y * y, axis=1, keepdims=True)   # (Cout, 1)
    stats_ref[...] = jnp.concatenate([s, ss], axis=1)[None]


def _bn_relu_kernel(scale_ref, shift_ref, y_ref, o_ref):
    """One M-tile: y * scale + shift, ReLU — all lane-dense VPU work."""
    o_ref[...] = jnp.maximum(y_ref[...] * scale_ref[...] + shift_ref[...], 0.0)


@functools.partial(jax.jit, static_argnames=("compute_dtype", "tile_m"))
def luconv_pallas(x_ncdhw, weight, bias, gamma, beta,
                  compute_dtype=jnp.bfloat16, tile_m=512):
    """x: (N, Cin, D, H, W); weight: (Cout, Cin, 3, 3, 3) -> (N, Cout, D, H, W)."""
    del bias  # conv bias cancels exactly under training-mode batch norm
    N, Cin, D, H, W = x_ncdhw.shape
    Cout = weight.shape[0]
    M = N * D * H * W
    K = 27 * Cin
    assert tile_m % 128 == 0

    num_tiles = pl.cdiv(M, tile_m)
    M_pad = num_tiles * tile_m

    # ---- layout glue: channels-first im2col; lane axis = flattened N*D*H*W ----
    xc = jnp.transpose(x_ncdhw, (1, 0, 2, 3, 4))                 # (Cin, N, D, H, W)
    xp = jnp.pad(xc, ((0, 0), (0, 0), (1, 1), (1, 1), (1, 1)))   # zero pad=1
    taps, wts = [], []
    for kd in range(3):
        for kh in range(3):
            for kw in range(3):
                taps.append(
                    xp[:, :, kd:kd + D, kh:kh + H, kw:kw + W].reshape(Cin, M))
                wts.append(weight[:, :, kd, kh, kw])             # (Cout, Cin)
    x_col = jnp.concatenate(taps, axis=0)                        # (K, M)
    w_col = jnp.concatenate(wts, axis=1)                         # (Cout, K)
    # NOTE: for production VNet sizes, pass the padded volume once and form the
    # 27 shifted windows in-kernel from a halo'd D-slab instead of materializing
    # the 27x im2col in HBM; kept explicit here for simplicity at small shapes.
    if M_pad != M:
        # zero columns contribute 0 to sum/sumsq, so stats stay exact (divide by true M)
        x_col = jnp.pad(x_col, ((0, 0), (0, M_pad - M)))
    x_col = x_col.astype(compute_dtype)
    w_col = w_col.astype(compute_dtype)

    cparams = pltpu.CompilerParams(
        dimension_semantics=("parallel",),
        vmem_limit_bytes=32 * 1024 * 1024,
    )

    # ---- pass 1: conv (single fused matmul per tile) + per-tile partial stats ----
    y_flat, part_stats = pl.pallas_call(
        _conv_stats_kernel,
        grid=(num_tiles,),
        in_specs=[
            pl.BlockSpec((Cout, K), lambda i: (0, 0)),           # weights: VMEM-resident
            pl.BlockSpec((K, tile_m), lambda i: (0, i)),         # im2col tile
        ],
        out_specs=[
            pl.BlockSpec((Cout, tile_m), lambda i: (0, i)),      # conv output (lane-dense)
            pl.BlockSpec((1, Cout, 2), lambda i: (i, 0, 0)),     # partial [sum, sumsq]
        ],
        out_shape=[
            jax.ShapeDtypeStruct((Cout, M_pad), jnp.float32),
            jax.ShapeDtypeStruct((num_tiles, Cout, 2), jnp.float32),
        ],
        compiler_params=cparams,
    )(w_col, x_col)

    # ---- tiny cross-tile reduction + BN scale/shift (plain JAX) ----
    totals = jnp.sum(part_stats, axis=0)                         # (Cout, 2)
    mean = totals[:, 0] / M
    var = jnp.maximum(totals[:, 1] / M - mean * mean, 0.0)       # biased var (training BN)
    inv = lax.rsqrt(var + EPS)
    g = gamma.astype(jnp.float32)
    scale = (g * inv).reshape(Cout, 1)
    shift = (beta.astype(jnp.float32) - mean * g * inv).reshape(Cout, 1)

    # ---- pass 2: normalize + ReLU (lane-dense) ----
    out_flat = pl.pallas_call(
        _bn_relu_kernel,
        grid=(num_tiles,),
        in_specs=[
            pl.BlockSpec((Cout, 1), lambda i: (0, 0)),           # scale (resident)
            pl.BlockSpec((Cout, 1), lambda i: (0, 0)),           # shift (resident)
            pl.BlockSpec((Cout, tile_m), lambda i: (0, i)),
        ],
        out_specs=pl.BlockSpec((Cout, tile_m), lambda i: (0, i)),
        out_shape=jax.ShapeDtypeStruct((Cout, M_pad), jnp.float32),
        compiler_params=cparams,
    )(scale, shift, y_flat)

    out = out_flat[:, :M].reshape(Cout, N, D, H, W)
    return jnp.transpose(out, (1, 0, 2, 3, 4))


def luconv_reference(x_ncdhw, weight, bias, gamma, beta):
    """Pure-JAX reference matching the PyTorch forward (includes conv bias)."""
    y = lax.conv_general_dilated(
        x_ncdhw.astype(jnp.float32), weight.astype(jnp.float32),
        window_strides=(1, 1, 1), padding=((1, 1), (1, 1), (1, 1)),
        dimension_numbers=("NCDHW", "OIDHW", "NCDHW"))
    y = y + bias.reshape(1, -1, 1, 1, 1)
    mean = jnp.mean(y, axis=(0, 2, 3, 4), keepdims=True)
    var = jnp.mean((y - mean) ** 2, axis=(0, 2, 3, 4), keepdims=True)
    yn = (y - mean) * lax.rsqrt(var + EPS)
    yn = yn * gamma.reshape(1, -1, 1, 1, 1) + beta.reshape(1, -1, 1, 1, 1)
    return jnp.maximum(yn, 0.0)


if __name__ == "__main__":
    key = jax.random.PRNGKey(0)
    k_x, k_w, k_b, k_g, k_be = jax.random.split(key, 5)

    N, Cin, Cout, D, H, W = 2, 4, 8, 8, 8, 8
    x = jax.random.normal(k_x, (N, Cin, D, H, W), dtype=jnp.float32)
    weight = 0.1 * jax.random.normal(k_w, (Cout, Cin, 3, 3, 3), dtype=jnp.float32)
    bias = 0.1 * jax.random.normal(k_b, (Cout,), dtype=jnp.float32)
    gamma = 1.0 + 0.1 * jax.random.normal(k_g, (Cout,), dtype=jnp.float32)
    beta = 0.1 * jax.random.normal(k_be, (Cout,), dtype=jnp.float32)

    ref = luconv_reference(x, weight, bias, gamma, beta)

    # f32 operands: tight check against the f32 reference.
    out_f32 = jax.block_until_ready(
        luconv_pallas(x, weight, bias, gamma, beta, compute_dtype=jnp.float32))
    assert out_f32.shape == (N, Cout, D, H, W), out_f32.shape
    assert jnp.allclose(out_f32, ref, rtol=1e-3, atol=1e-3), float(
        jnp.max(jnp.abs(out_f32 - ref)))

    # bf16 operands (perf default): f32 accumulation; tolerance reflects bf16
    # input rounding (~0.4% relative).
    out_bf16 = jax.block_until_ready(
        luconv_pallas(x, weight, bias, gamma, beta, compute_dtype=jnp.bfloat16))
    assert out_bf16.shape == (N, Cout, D, H, W), out_bf16.shape
    assert jnp.allclose(out_bf16, ref, rtol=2e-2, atol=2e-2), float(
        jnp.max(jnp.abs(out_bf16 - ref)))

    print("KERNEL_OK")
</pallas_src>

<mosaic_0001>
module attributes {stable_mosaic.version = 11 : i64} {
  func.func @_conv_stats_kernel(%arg0: i32, %arg1: memref<8x108xf32, #tpu.memory_space<vmem>>, %arg2: memref<108x512xf32, #tpu.memory_space<vmem>>, %arg3: memref<8x512xf32, #tpu.memory_space<vmem>>, %arg4: memref<1x8x2xf32, #tpu.memory_space<vmem>>) attributes {dimension_semantics = [#tpu.dimension_semantics<parallel>], iteration_bounds = array<i64: 2>, scalar_prefetch = 0 : i64, scratch_operands = 0 : i64, tpu.core_type = #tpu.core_type<tc>, window_params = [{pipeline_mode = #tpu.pipeline_mode<synchronous>, transform_indices = @transform_0, window_bounds = array<i64: 8, 108>}, {transform_indices = @transform_1, window_bounds = array<i64: 108, 512>}, {transform_indices = @transform_2, window_bounds = array<i64: 8, 512>}, {transform_indices = @transform_3, window_bounds = array<i64: 1, 8, 2>}]} {
    %c0 = arith.constant 0 : index
    %c0_0 = arith.constant 0 : index
    %0 = vector.load %arg1[%c0, %c0_0] : memref<8x108xf32, #tpu.memory_space<vmem>>, vector<8x108xf32>
    %c0_1 = arith.constant 0 : index
    %c0_2 = arith.constant 0 : index
    %1 = vector.load %arg2[%c0_1, %c0_2] : memref<108x512xf32, #tpu.memory_space<vmem>>, vector<108x512xf32>
    %cst = arith.constant dense<0.000000e+00> : vector<8x512xf32>
    %2 = tpu.matmul %0, %1, %cst {dimension_numbers = #tpu.dot_dimension_numbers<[1], [0], [0], [1], [0, 0, 1, 1], [], []>} : vector<8x108xf32>, vector<108x512xf32>, vector<8x512xf32> -> vector<8x512xf32>
    %c0_3 = arith.constant 0 : index
    %c0_4 = arith.constant 0 : index
    %3 = vector.load %arg3[%c0_3, %c0_4] : memref<8x512xf32, #tpu.memory_space<vmem>>, vector<8x512xf32>
    tpu.vector_store %arg3[%c0_3, %c0_4], %2 {strides = array<i32>} : memref<8x512xf32, #tpu.memory_space<vmem>>, vector<8x512xf32>,
    %cst_5 = arith.constant dense<0.000000e+00> : vector<8xf32>
    %4 = vector.multi_reduction <add>, %2, %cst_5 [1] : vector<8x512xf32> to vector<8xf32>
    %5 = vector.shape_cast %4 : vector<8xf32> to vector<8x1xf32>
    %6 = arith.mulf %2, %2 : vector<8x512xf32>
    %cst_6 = arith.constant dense<0.000000e+00> : vector<8xf32>
    %7 = vector.multi_reduction <add>, %6, %cst_6 [1] : vector<8x512xf32> to vector<8xf32>
    %8 = vector.shape_cast %7 : vector<8xf32> to vector<8x1xf32>
    %9 = tpu.concatenate %5, %8 in 1 : vector<8x1xf32>, vector<8x1xf32> -> vector<8x2xf32>
    %10 = vector.shape_cast %9 : vector<8x2xf32> to vector<1x8x2xf32>
    %c0_7 = arith.constant 0 : index
    %c0_8 = arith.constant 0 : index
    %c0_9 = arith.constant 0 : index
    %11 = vector.load %arg4[%c0_7, %c0_8, %c0_9] : memref<1x8x2xf32, #tpu.memory_space<vmem>>, vector<1x8x2xf32>
    tpu.vector_store %arg4[%c0_7, %c0_8, %c0_9], %10 {strides = array<i32>} : memref<1x8x2xf32, #tpu.memory_space<vmem>>, vector<1x8x2xf32>,
    return
  }
  func.func @transform_0(%arg0: i32) -> (i32, i32) {
    %c0_i32 = arith.constant 0 : i32
    %c0_i32_0 = arith.constant 0 : i32
    %c0_i32_1 = arith.constant 0 : i32
    return %c0_i32, %c0_i32_0 : i32, i32
  }
  func.func @transform_1(%arg0: i32) -> (i32, i32) {
    %c0_i32 = arith.constant 0 : i32
    %c0_i32_0 = arith.constant 0 : i32
    return %c0_i32, %arg0 : i32, i32
  }
  func.func @transform_2(%arg0: i32) -> (i32, i32) {
    %c0_i32 = arith.constant 0 : i32
    %c0_i32_0 = arith.constant 0 : i32
    return %c0_i32, %arg0 : i32, i32
  }
  func.func @transform_3(%arg0: i32) -> (i32, i32, i32) {
    %c0_i32 = arith.constant 0 : i32
    %c0_i32_0 = arith.constant 0 : i32
    %c0_i32_1 = arith.constant 0 : i32
    return %arg0, %c0_i32, %c0_i32_0 : i32, i32, i32
  }
}

module attributes {stable_mosaic.version = 11 : i64} {
  func.func @_bn_relu_kernel(%arg0: i32, %arg1: memref<8x1xf32, #tpu.memory_space<vmem>>, %arg2: memref<8x1xf32, #tpu.memory_space<vmem>>, %arg3: memref<8x512xf32, #tpu.memory_space<vmem>>, %arg4: memref<8x512xf32, #tpu.memory_space<vmem>>) attributes {dimension_semantics = [#tpu.dimension_semantics<parallel>], iteration_bounds = array<i64: 2>, scalar_prefetch = 0 : i64, scratch_operands = 0 : i64, tpu.core_type = #tpu.core_type<tc>, window_params = [{pipeline_mode = #tpu.pipeline_mode<synchronous>, transform_indices = @transform_0, window_bounds = array<i64: 8, 1>}, {pipeline_mode = #tpu.pipeline_mode<synchronous>, transform_indices = @transform_1, window_bounds = array<i64: 8, 1>}, {transform_indices = @transform_2, window_bounds = array<i64: 8, 512>}, {transform_indices = @transform_3, window_bounds = array<i64: 8, 512>}]} {
    %c0 = arith.constant 0 : index
    %c0_0 = arith.constant 0 : index
    %0 = vector.load %arg3[%c0, %c0_0] : memref<8x512xf32, #tpu.memory_space<vmem>>, vector<8x512xf32>
    %c0_1 = arith.constant 0 : index
    %c0_2 = arith.constant 0 : index
    %1 = vector.load %arg1[%c0_1, %c0_2] : memref<8x1xf32, #tpu.memory_space<vmem>>, vector<8x1xf32>
    %2 = vector.broadcast %1 : vector<8x1xf32> to vector<8x512xf32>
    %3 = arith.mulf %0, %2 : vector<8x512xf32>
    %c0_3 = arith.constant 0 : index
    %c0_4 = arith.constant 0 : index
    %4 = vector.load %arg2[%c0_3, %c0_4] : memref<8x1xf32, #tpu.memory_space<vmem>>, vector<8x1xf32>
    %5 = vector.broadcast %4 : vector<8x1xf32> to vector<8x512xf32>
    %6 = arith.addf %3, %5 : vector<8x512xf32>
    %cst = arith.constant 0.000000e+00 : f32
    %7 = vector.broadcast %cst : f32 to vector<8x512xf32>
    %8 = arith.maximumf %6, %7 : vector<8x512xf32>
    %c0_5 = arith.constant 0 : index
    %c0_6 = arith.constant 0 : index
    %9 = vector.load %arg4[%c0_5, %c0_6] : memref<8x512xf32, #tpu.memory_space<vmem>>, vector<8x512xf32>
    tpu.vector_store %arg4[%c0_5, %c0_6], %8 {strides = array<i32>} : memref<8x512xf32, #tpu.memory_space<vmem>>, vector<8x512xf32>,
    return
  }
  func.func @transform_0(%arg0: i32) -> (i32, i32) {
    %c0_i32 = arith.constant 0 : i32
    %c0_i32_0 = arith.constant 0 : i32
    %c0_i32_1 = arith.constant 0 : i32
    return %c0_i32, %c0_i32_0 : i32, i32
  }
  func.func @transform_1(%arg0: i32) -> (i32, i32) {
    %c0_i32 = arith.constant 0 : i32
    %c0_i32_0 = arith.constant 0 : i32
    %c0_i32_1 = arith.constant 0 : i32
    return %c0_i32, %c0_i32_0 : i32, i32
  }
  func.func @transform_2(%arg0: i32) -> (i32, i32) {
    %c0_i32 = arith.constant 0 : i32
    %c0_i32_0 = arith.constant 0 : i32
    return %c0_i32, %arg0 : i32, i32
  }
  func.func @transform_3(%arg0: i32) -> (i32, i32) {
    %c0_i32 = arith.constant 0 : i32
    %c0_i32_0 = arith.constant 0 : i32
    return %c0_i32, %arg0 : i32, i32
  }
}

</mosaic_0001>

<bundles_post_ra>
// kernel: luconv_pallas.2
= control target key start
LH: loop header
LB: loop body
LE: loop exit
PB: predicated region body
PF: predicated region fallthrough
CT: control target
= control target key end

     0   :  { %s798_s12 = smov 0   ;;  %s800_s13 = smov 0   ;;  %s1033_s0 = inlined_call_operand.vmem [shape: f32[8,108], index: 0, kind: input, shape index: {}]   ;;  %s1034_s1 = inlined_call_operand.vmem [shape: f32[108,1024], index: 1, kind: input, shape index: {}]   ;;  %s1035_s2 = inlined_call_operand.vmem [shape: f32[8,1024], index: 2, kind: output, shape index: {0}]   ;;  %s1036_s3 = inlined_call_operand.vmem [shape: f32[2,8,2], index: 3, kind: output, shape index: {1}]  }
   0x1   :  { %s802_s14 = smov 0  }
   0x2 LB: > { %s814_s15 = sadd.s32 4294967295, %s774_s14   ;;  %s817_s16 = sadd.s32 1, %s774_s14   ;;  %s774_s14 = sphi %s802_s14, %s1039_s14   ;;  %s770_s13 = sphi %s800_s13, %s1038_s13   ;;  %s766_s12 = sphi %s798_s12, %s1037_s12  }
   0x3   : > { %s39_s17 = ssub.s32 %s774_s14, %s817_s16  ;;  %s42_s18 = sadd.s32 1, %s770_s13 }
   0x4   : > { %p40_p0 = scmp.eq.s32.totalorder %s39_s17, 0  ;;  %p49_p1 = scmp.ne.s32.totalorder %s770_s13, %s766_s12 }
   0x5   : > { %p50_p2 = scmp.eq.s32.totalorder %s774_s14, 0  ;;  %p648_p4 = scmp.ge.s32.totalorder %s774_s14, 2 }
   0x6   : > { %s826_s19 = scalar_select %p40_p0, %s770_s13, %s42_s18  }
   0x7   : > { %p51_p3 = por %p50_p2, %p49_p1  ;;  %130 = sbr.rel (%p648_p4) target bundleno = 47 (0x2f), region = 20 }
   0xe   : > { %133 = sbr.rel (!%p51_p3) target bundleno = 47 (0x2f), region = 24  ;;  %s135_s20 = sand.u32 (%p51_p3), 1, %s770_s13  }
   0xf   : > { %s663_s21 = sshll.u32 (%p51_p3), %s774_s14, 5  ;;  %s724_s22 = smul.u32 (%p51_p3), 448, %s135_s20 }
  0x10   : > { %s834_s25 = scalar_lea.vmem (%p51_p3), %s1034_s1, %s663_s21 }
  0x11   : > { %v153_v0 = vld [vmem:[%s834_s25] sm:$0xff] (%p51_p3)  ;;  %v155_v1 = vld [vmem:[%s834_s25 + $0x8] sm:$0xff] (%p51_p3)  ;;  %v157_v2 = vld [vmem:[%s834_s25 + $0x10] sm:$0xff] (%p51_p3)  ;;  %s842_s26 = scalar_lea.vmem (%p51_p3), [#allocation2], %s724_s22 }
  0x12   : > { %v159_v3 = vld [vmem:[%s834_s25 + $0x18] sm:$0xff] (%p51_p3)  ;;  %v161_v4 = vld [vmem:[%s834_s25 + $0x40] sm:$0xff] (%p51_p3)  ;;  %v163_v5 = vld [vmem:[%s834_s25 + $0x48] sm:$0xff] (%p51_p3)  ;;  %154 = vst [vmem:[%s842_s26] sm:$0xff] (%p51_p3), %v153_v0 }
  0x13   : > { %156 = vst [vmem:[%s842_s26 + $0x8] sm:$0xff] (%p51_p3), %v155_v1  ;;  %158 = vst [vmem:[%s842_s26 + $0x10] sm:$0xff] (%p51_p3), %v157_v2  ;;  %v165_v6 = vld [vmem:[%s834_s25 + $0x50] sm:$0xff] (%p51_p3)  ;;  %v167_v7 = vld [vmem:[%s834_s25 + $0x58] sm:$0xff] (%p51_p3) }
  0x14   : > { %160 = vst [vmem:[%s842_s26 + $0x18] sm:$0xff] (%p51_p3), %v159_v3  ;;  %162 = vst [vmem:[%s842_s26 + $0x20] sm:$0xff] (%p51_p3), %v161_v4  ;;  %v169_v8 = vld [vmem:[%s834_s25 + $0x80] sm:$0xff] (%p51_p3)  ;;  %v171_v9 = vld [vmem:[%s834_s25 + $0x88] sm:$0xff] (%p51_p3) }
  0x15   : > { %164 = vst [vmem:[%s842_s26 + $0x28] sm:$0xff] %v163_v5  ;;  %166 = vst [vmem:[%s842_s26 + $0x30] sm:$0xff] %v165_v6  ;;  %v173_v10 = vld [vmem:[%s834_s25 + $0x90] sm:$0xff]  ;;  %v175_v11 = vld [vmem:[%s834_s25 + $0x98] sm:$0xff] }
  0x16   : > { %168 = vst [vmem:[%s842_s26 + $0x38] sm:$0xff] %v167_v7  ;;  %170 = vst [vmem:[%s842_s26 + $0x40] sm:$0xff] %v169_v8  ;;  %v177_v12 = vld [vmem:[%s834_s25 + $0xc0] sm:$0xff]  ;;  %v179_v13 = vld [vmem:[%s834_s25 + $0xc8] sm:$0xff] }
  0x17   : > { %172 = vst [vmem:[%s842_s26 + $0x48] sm:$0xff] %v171_v9  ;;  %174 = vst [vmem:[%s842_s26 + $0x50] sm:$0xff] %v173_v10  ;;  %v181_v14 = vld [vmem:[%s834_s25 + $0xd0] sm:$0xff]  ;;  %v183_v15 = vld [vmem:[%s834_s25 + $0xd8] sm:$0xff] }
  0x18   : > { %176 = vst [vmem:[%s842_s26 + $0x58] sm:$0xff] %v175_v11  ;;  %178 = vst [vmem:[%s842_s26 + $0x60] sm:$0xff] %v177_v12  ;;  %v185_v16 = vld [vmem:[%s834_s25 + $0x100] sm:$0xff]  ;;  %v187_v17 = vld [vmem:[%s834_s25 + $0x108] sm:$0xff] }
  0x19   : > { %180 = vst [vmem:[%s842_s26 + $0x68] sm:$0xff] %v179_v13  ;;  %182 = vst [vmem:[%s842_s26 + $0x70] sm:$0xff] %v181_v14  ;;  %v189_v18 = vld [vmem:[%s834_s25 + $0x110] sm:$0xff]  ;;  %v191_v19 = vld [vmem:[%s834_s25 + $0x118] sm:$0xff] }
  0x1a   : > { %184 = vst [vmem:[%s842_s26 + $0x78] sm:$0xff] %v183_v15  ;;  %186 = vst [vmem:[%s842_s26 + $0x80] sm:$0xff] %v185_v16  ;;  %v193_v20 = vld [vmem:[%s834_s25 + $0x140] sm:$0xff]  ;;  %v195_v21 = vld [vmem:[%s834_s25 + $0x148] sm:$0xff] }
  0x1b   : > { %188 = vst [vmem:[%s842_s26 + $0x88] sm:$0xff] %v187_v17  ;;  %190 = vst [vmem:[%s842_s26 + $0x90] sm:$0xff] %v189_v18  ;;  %v197_v22 = vld [vmem:[%s834_s25 + $0x150] sm:$0xff]  ;;  %v199_v23 = vld [vmem:[%s834_s25 + $0x158] sm:$0xff] }
  0x1c   : > { %192 = vst [vmem:[%s842_s26 + $0x98] sm:$0xff] %v191_v19  ;;  %194 = vst [vmem:[%s842_s26 + $0xa0] sm:$0xff] %v193_v20  ;;  %v201_v24 = vld [vmem:[%s834_s25 + $0x180] sm:$0xff]  ;;  %v203_v25 = vld [vmem:[%s834_s25 + $0x188] sm:$0xff] }
  0x1d   : > { %196 = vst [vmem:[%s842_s26 + $0xa8] sm:$0xff] %v195_v21  ;;  %198 = vst [vmem:[%s842_s26 + $0xb0] sm:$0xff] %v197_v22  ;;  %v205_v26 = vld [vmem:[%s834_s25 + $0x190] sm:$0xff]  ;;  %v207_v27 = vld [vmem:[%s834_s25 + $0x198] sm:$0xff] }
  0x1e   : > { %200 = vst [vmem:[%s842_s26 + $0xb8] sm:$0xff] %v199_v23  ;;  %202 = vst [vmem:[%s842_s26 + $0xc0] sm:$0xff] %v201_v24  ;;  %v209_v28 = vld [vmem:[%s834_s25 + $0x1c0] sm:$0xff]  ;;  %v211_v29 = vld [vmem:[%s834_s25 + $0x1c8] sm:$0xff] }
  0x1f   : > { %204 = vst [vmem:[%s842_s26 + $0xc8] sm:$0xff] %v203_v25  ;;  %206 = vst [vmem:[%s842_s26 + $0xd0] sm:$0xff] %v205_v26  ;;  %v213_v30 = vld [vmem:[%s834_s25 + $0x1d0] sm:$0xff]  ;;  %v215_v31 = vld [vmem:[%s834_s25 + $0x1d8] sm:$0xff] }
  0x20   : > { %208 = vst [vmem:[%s842_s26 + $0xd8] sm:$0xff] %v207_v27  ;;  %210 = vst [vmem:[%s842_s26 + $0xe0] sm:$0xff] %v209_v28  ;;  %v217_v32 = vld [vmem:[%s834_s25 + $0x200] sm:$0xff]  ;;  %v219_v33 = vld [vmem:[%s834_s25 + $0x208] sm:$0xff] }
  0x21   : > { %212 = vst [vmem:[%s842_s26 + $0xe8] sm:$0xff] %v211_v29  ;;  %214 = vst [vmem:[%s842_s26 + $0xf0] sm:$0xff] %v213_v30  ;;  %v221_v34 = vld [vmem:[%s834_s25 + $0x210] sm:$0xff]  ;;  %v223_v35 = vld [vmem:[%s834_s25 + $0x218] sm:$0xff] }
  0x22   : > { %216 = vst [vmem:[%s842_s26 + $0xf8] sm:$0xff] %v215_v31  ;;  %218 = vst [vmem:[%s842_s26 + $0x100] sm:$0xff] %v217_v32  ;;  %v225_v36 = vld [vmem:[%s834_s25 + $0x240] sm:$0xff]  ;;  %v227_v37 = vld [vmem:[%s834_s25 + $0x248] sm:$0xff] }
  0x23   : > { %220 = vst [vmem:[%s842_s26 + $0x108] sm:$0xff] %v219_v33  ;;  %222 = vst [vmem:[%s842_s26 + $0x110] sm:$0xff] %v221_v34  ;;  %v229_v38 = vld [vmem:[%s834_s25 + $0x250] sm:$0xff]  ;;  %v231_v39 = vld [vmem:[%s834_s25 + $0x258] sm:$0xff] }
  0x24   : > { %224 = vst [vmem:[%s842_s26 + $0x118] sm:$0xff] %v223_v35  ;;  %226 = vst [vmem:[%s842_s26 + $0x120] sm:$0xff] %v225_v36  ;;  %v233_v40 = vld [vmem:[%s834_s25 + $0x280] sm:$0xff]  ;;  %v235_v41 = vld [vmem:[%s834_s25 + $0x288] sm:$0xff] }
  0x25   : > { %228 = vst [vmem:[%s842_s26 + $0x128] sm:$0xff] %v227_v37  ;;  %230 = vst [vmem:[%s842_s26 + $0x130] sm:$0xff] %v229_v38  ;;  %v237_v42 = vld [vmem:[%s834_s25 + $0x290] sm:$0xff]  ;;  %v239_v43 = vld [vmem:[%s834_s25 + $0x298] sm:$0xff] }
  0x26   : > { %232 = vst [vmem:[%s842_s26 + $0x138] sm:$0xff] %v231_v39  ;;  %234 = vst [vmem:[%s842_s26 + $0x140] sm:$0xff] %v233_v40  ;;  %v241_v44 = vld [vmem:[%s834_s25 + $0x2c0] sm:$0xff]  ;;  %v243_v45 = vld [vmem:[%s834_s25 + $0x2c8] sm:$0xff] }
  0x27   : > { %236 = vst [vmem:[%s842_s26 + $0x148] sm:$0xff] %v235_v41  ;;  %238 = vst [vmem:[%s842_s26 + $0x150] sm:$0xff] %v237_v42  ;;  %v245_v46 = vld [vmem:[%s834_s25 + $0x2d0] sm:$0xff]  ;;  %v247_v47 = vld [vmem:[%s834_s25 + $0x2d8] sm:$0xff] }
  0x28   : > { %240 = vst [vmem:[%s842_s26 + $0x158] sm:$0xff] %v239_v43  ;;  %242 = vst [vmem:[%s842_s26 + $0x160] sm:$0xff] %v241_v44  ;;  %v249_v48 = vld [vmem:[%s834_s25 + $0x300] sm:$0xff]  ;;  %v251_v49 = vld [vmem:[%s834_s25 + $0x308] sm:$0xff] }
  0x29   : > { %244 = vst [vmem:[%s842_s26 + $0x168] sm:$0xff] %v243_v45  ;;  %246 = vst [vmem:[%s842_s26 + $0x170] sm:$0xff] %v245_v46  ;;  %v253_v50 = vld [vmem:[%s834_s25 + $0x310] sm:$0xff]  ;;  %v255_v51 = vld [vmem:[%s834_s25 + $0x318] sm:$0xff] }
  0x2a   : > { %248 = vst [vmem:[%s842_s26 + $0x178] sm:$0xff] %v247_v47  ;;  %250 = vst [vmem:[%s842_s26 + $0x180] sm:$0xff] %v249_v48  ;;  %v257_v52 = vld [vmem:[%s834_s25 + $0x340] sm:$0xff]  ;;  %v259_v53 = vld [vmem:[%s834_s25 + $0x348] sm:$0xff] }
  0x2b   : > { %252 = vst [vmem:[%s842_s26 + $0x188] sm:$0xff] %v251_v49  ;;  %254 = vst [vmem:[%s842_s26 + $0x190] sm:$0xff] %v253_v50  ;;  %v261_v54 = vld [vmem:[%s834_s25 + $0x350] sm:$0xff]  ;;  %v263_v55 = vld [vmem:[%s834_s25 + $0x358] sm:$0xff] }
  0x2c   : > { %256 = vst [vmem:[%s842_s26 + $0x198] sm:$0xff] %v255_v51  ;;  %258 = vst [vmem:[%s842_s26 + $0x1a0] sm:$0xff] %v257_v52 }
  0x2d   : > { %260 = vst [vmem:[%s842_s26 + $0x1a8] sm:$0xff] %v259_v53  ;;  %262 = vst [vmem:[%s842_s26 + $0x1b0] sm:$0xff] %v261_v54 }
  0x2e   : > { %264 = vst [vmem:[%s842_s26 + $0x1b8] sm:$0xff] %v263_v55 }
  0x2f PF: > { %p651_p5 = scmp.ge.s32.totalorder %s774_s14, 1  ;;  %p269_p6 = scmp.lt.s32.totalorder %s774_s14, 3 }
  0x31   : > { %p270_p7 = pnand %p651_p5, %p269_p6 }
  0x32   : > { %s276_s27 = sand.u32 (!%p270_p7), 1, %s766_s12   ;;  %v776_v56 = vmov (!%p270_p7), 0.0   ;;  %vm375_vm0 = vcmask (!%p270_p7), 1043456   ;;  %vm777_vm1 = vmmov (!%p270_p7), 1   ;;  %vm371_vm3 = vcmask (!%p270_p7), 883712   ;;  %s652_s5 = sshll.u32 (!%p270_p7), %s814_s15, 2 }
  0x33   : > { %273 = sbr.rel (%p270_p7) target bundleno = 454 (0x1c6), region = 47  ;;  %452 = vmatprep.mubr.f32.mxu0 (!%p270_p7), %v776_v56  ;;  %523 = vmatprep.mubr.f32.mxu1 (!%p270_p7), %v776_v56  ;;  %vm689_vm2 = vmpackc.low (!%p270_p7), %vm375_vm0, %vm777_vm1  ;;  %p305_p8 = scmp.lt.s32.totalorder (!%p270_p7), %s652_s5, 7  ;;  %vm548_vm4 = vcmask (!%p270_p7), 7168   ;;  %vm550_vm5 = vcmask (!%p270_p7), 15360  }
  0x34   : > { %s725_s28 = smul.u32 (!%p270_p7), 448, %s276_s27  ;;  %p310_p9 = scmp.lt.s32.totalorder (!%p270_p7), %s814_s15, 1 }
  0x36   : > { %s953_s29 = scalar_lea.vmem (!%p270_p7), [#allocation2], %s725_s28 }
  0x37   : > { %v316_v57 = vld [vmem:[%s953_s29 + $0x8] sm:$0xff] (!%p270_p7)  ;;  %v315_v59 = vld [vmem:[%s953_s29] sm:$0xff] (!%p270_p7)  ;;  %v318_v62 = vld [vmem:[%s953_s29 + $0x18] sm:$0xff] (!%p270_p7) }
  0x38   : > { %v320_v58 = vld [vmem:[%s953_s29 + $0x28] sm:$0xff] (!%p270_p7)  ;;  %v319_v61 = vld [vmem:[%s953_s29 + $0x20] sm:$0xff] (!%p270_p7)  ;;  %v322_v63 = vld [vmem:[%s953_s29 + $0x38] sm:$0xff] (!%p270_p7) }
  0x39   : > { %v664_v60 = vpack.c.bf16 (!%p270_p7), %v320_v58, %v316_v57  ;;  %v666_v0 = vpack.c.bf16 (!%p270_p7), %v319_v61, %v315_v59  ;;  %v694_v1 = vpack.c.bf16 (!%p270_p7), %v322_v63, %v318_v62  ;;  %v317_v2 = vld [vmem:[%s953_s29 + $0x10] sm:$0xff] (!%p270_p7)  ;;  %v324_v4 = vld [vmem:[%s953_s29 + $0x48] sm:$0xff] (!%p270_p7)  ;;  %v323_v7 = vld [vmem:[%s953_s29 + $0x40] sm:$0xff] (!%p270_p7) }
  0x3a   : > { %v321_v3 = vld [vmem:[%s953_s29 + $0x30] sm:$0xff]  ;;  %v328_v6 = vld [vmem:[%s953_s29 + $0x68] sm:$0xff]  ;;  %v327_v8 = vld [vmem:[%s953_s29 + $0x60] sm:$0xff]  ;;  %s1041_s5 = smov (!%p305_p8, %s652_s5), 7  ;;  %s1043_s15 = smov (!%p310_p9, %s814_s15), 1 }
  0x3b   : > { %665 = vmatprep.subr.bf16.mxu0 %v664_v60  ;;  %v696_v5 = vpack.c.bf16 %v321_v3, %v317_v2  ;;  %695 = vmatprep.subr.bf16.mxu1 %v694_v1  ;;  %v668_v9 = vpack.c.bf16 %v328_v6, %v324_v4  ;;  %v670_v10 = vpack.c.bf16 %v327_v8, %v323_v7  ;;  %v326_v11 = vld [vmem:[%s953_s29 + $0x58] sm:$0xff]  ;;  %v325_v13 = vld [vmem:[%s953_s29 + $0x50] sm:$0xff]  ;;  %v332_v16 = vld [vmem:[%s953_s29 + $0x88] sm:$0xff]  ;;  %s653_s6 = sshll.u32 %s1041_s5, 3  ;;  %s654_s10 = sshll.u32 %s1043_s15, 3 }
  0x3c   : > { %667 = vmatpush1.bf16.msra.mxu0 %v666_v0  ;;  %v330_v12 = vld [vmem:[%s953_s29 + $0x78] sm:$0xff]  ;;  %v329_v15 = vld [vmem:[%s953_s29 + $0x70] sm:$0xff]  ;;  %v336_v17 = vld [vmem:[%s953_s29 + $0xa8] sm:$0xff]  ;;  %s308_s9 = scalar_lea.vmem %s1035_s2, %s653_s6  ;;  %s313_s14 = scalar_lea.vmem %s1036_s3, %s654_s10 }
  0x3d   : > { %697 = vmatpush1.bf16.msra.mxu1 %v696_v5  ;;  %v698_v14 = vpack.c.bf16 %v330_v12, %v326_v11  ;;  %669 = vmatprep.subr.bf16.mxu0 %v668_v9  ;;  %v700_v18 = vpack.c.bf16 %v329_v15, %v325_v13  ;;  %v672_v19 = vpack.c.bf16 %v336_v17, %v332_v16  ;;  %v331_v20 = vld [vmem:[%s953_s29 + $0x80] sm:$0xff]  ;;  %v334_v22 = vld [vmem:[%s953_s29 + $0x98] sm:$0xff]  ;;  %v333_v24 = vld [vmem:[%s953_s29 + $0x90] sm:$0xff] }
  0x3e   : > { %v335_v21 = vld [vmem:[%s953_s29 + $0xa0] sm:$0xff]  ;;  %v338_v23 = vld [vmem:[%s953_s29 + $0xb8] sm:$0xff]  ;;  %v337_v25 = vld [vmem:[%s953_s29 + $0xb0] sm:$0xff] }
  0x3f   : > { %699 = vmatprep.subr.bf16.mxu1 %v698_v14  ;;  %v674_v26 = vpack.c.bf16 %v335_v21, %v331_v20  ;;  %v702_v27 = vpack.c.bf16 %v338_v23, %v334_v22  ;;  %v340_v28 = vld [vmem:[%s953_s29 + $0xc8] sm:$0xff]  ;;  %v339_v30 = vld [vmem:[%s953_s29 + $0xc0] sm:$0xff]  ;;  %v704_v31 = vpack.c.bf16 %v337_v25, %v333_v24  ;;  %v342_v34 = vld [vmem:[%s953_s29 + $0xd8] sm:$0xff] }
  0x40   : > { %671 = vmatpush1.bf16.msra.mxu0 %v670_v10  ;;  %v344_v29 = vld [vmem:[%s953_s29 + $0xe8] sm:$0xff]  ;;  %v343_v33 = vld [vmem:[%s953_s29 + $0xe0] sm:$0xff]  ;;  %v346_v35 = vld [vmem:[%s953_s29 + $0xf8] sm:$0xff] }
  0x41   : > { %701 = vmatpush1.bf16.msra.mxu1 %v700_v18  ;;  %673 = vmatprep.subr.bf16.mxu0 %v672_v19  ;;  %v676_v32 = vpack.c.bf16 %v344_v29, %v340_v28  ;;  %v706_v36 = vpack.c.bf16 %v346_v35, %v342_v34  ;;  %v341_v37 = vld [vmem:[%s953_s29 + $0xd0] sm:$0xff]  ;;  %v348_v39 = vld [vmem:[%s953_s29 + $0x108] sm:$0xff]  ;;  %v678_v41 = vpack.c.bf16 %v343_v33, %v339_v30  ;;  %v350_v42 = vld [vmem:[%s953_s29 + $0x118] sm:$0xff] }
  0x42   : > { %703 = vmatprep.subr.bf16.mxu1 %v702_v27  ;;  %v345_v38 = vld [vmem:[%s953_s29 + $0xf0] sm:$0xff]  ;;  %v352_v40 = vld [vmem:[%s953_s29 + $0x128] sm:$0xff]  ;;  %v354_v43 = vld [vmem:[%s953_s29 + $0x138] sm:$0xff] }
  0x43   : > { %v708_v44 = vpack.c.bf16 %v345_v38, %v341_v37  ;;  %v680_v45 = vpack.c.bf16 %v352_v40, %v348_v39  ;;  %v347_v46 = vld [vmem:[%s953_s29 + $0x100] sm:$0xff]  ;;  %v349_v48 = vld [vmem:[%s953_s29 + $0x110] sm:$0xff]  ;;  %v710_v49 = vpack.c.bf16 %v354_v43, %v350_v42  ;;  %v356_v51 = vld [vmem:[%s953_s29 + $0x148] sm:$0xff] }
  0x44   : > { %675 = vmatpush1.bf16.msra.mxu0 %v674_v26  ;;  %v351_v47 = vld [vmem:[%s953_s29 + $0x120] sm:$0xff]  ;;  %v353_v50 = vld [vmem:[%s953_s29 + $0x130] sm:$0xff]  ;;  %v360_v52 = vld [vmem:[%s953_s29 + $0x168] sm:$0xff] }
  0x45   : > { %705 = vmatpush1.bf16.msra.mxu1 %v704_v31  ;;  %677 = vmatprep.subr.bf16.mxu0 %v676_v32  ;;  %v358_v53 = vld [vmem:[%s953_s29 + $0x158] sm:$0xff]  ;;  %v682_v55 = vpack.c.bf16 %v351_v47, %v347_v46  ;;  %v712_v56 = vpack.c.bf16 %v353_v50, %v349_v48  ;;  %v684_v57 = vpack.c.bf16 %v360_v52, %v356_v51  ;;  %v355_v58 = vld [vmem:[%s953_s29 + $0x140] sm:$0xff]  ;;  %v357_v60 = vld [vmem:[%s953_s29 + $0x150] sm:$0xff] }
  0x46   : > { %707 = vmatprep.subr.bf16.mxu1 %v706_v36  ;;  %v362_v54 = vld [vmem:[%s953_s29 + $0x178] sm:$0xff]  ;;  %v359_v59 = vld [vmem:[%s953_s29 + $0x160] sm:$0xff]  ;;  %v361_v62 = vld [vmem:[%s953_s29 + $0x170] sm:$0xff] }
  0x47   : > { %v714_v61 = vpack.c.bf16 %v362_v54, %v358_v53  ;;  %v364_v63 = vld [vmem:[%s953_s29 + $0x188] sm:$0xff]  ;;  %v366_v1 = vld [vmem:[%s953_s29 + $0x198] sm:$0xff]  ;;  %v686_v3 = vpack.c.bf16 %v359_v59, %v355_v58  ;;  %v716_v4 = vpack.c.bf16 %v361_v62, %v357_v60  ;;  %v363_v6 = vld [vmem:[%s953_s29 + $0x180] sm:$0xff] }
  0x48   : > { %679 = vmatpush1.bf16.msra.mxu0 %v678_v41  ;;  %v368_v0 = vld [vmem:[%s953_s29 + $0x1a8] sm:$0xf]  ;;  %v370_v2 = vld [vmem:[%s953_s29 + $0x1b8] sm:$0xf]  ;;  %v367_v7 = vld [vmem:[%s953_s29 + $0x1a0] sm:$0xf] }
  0x49   : > { %709 = vmatpush1.bf16.msra.mxu1 %v708_v44  ;;  %681 = vmatprep.subr.bf16.mxu0 %v680_v45  ;;  %v688_v5 = vpack.c.bf16 %v368_v0, %v364_v63  ;;  %v718_v8 = vpack.c.bf16 %v370_v2, %v366_v1  ;;  %v365_v9 = vld [vmem:[%s953_s29 + $0x190] sm:$0xff]  ;;  %v691_v11 = vpack.c.bf16 %v367_v7, %v363_v6  ;;  %v314_v13 = vld [vmem:[%s1033_s0] sm:$0xff] }
  0x4a   : > { %711 = vmatprep.subr.bf16.mxu1 %v710_v49  ;;  %v369_v10 = vld [vmem:[%s953_s29 + $0x1b0] sm:$0xf] }
  0x4b   : > { %v721_v12 = vpack.c.bf16 %v369_v10, %v365_v9 }
  0x4c   : > { %683 = vmatpush1.bf16.msra.mxu0 %v682_v55 }
  0x4d   : > { %713 = vmatpush1.bf16.msra.mxu1 %v712_v56  ;;  %685 = vmatprep.subr.bf16.mxu0 %v684_v57 }
  0x4e   : > { %715 = vmatprep.subr.bf16.mxu1 %v714_v61 }
  0x50   : > { %687 = vmatpush1.bf16.msra.mxu0 %v686_v3 }
  0x51   : > { %717 = vmatpush1.bf16.msra.mxu1 %v716_v4  ;;  %690 = vmatprep.subr.msk.bf16.mxu0 %vm689_vm2, %v688_v5 }
  0x52   : > { %720 = vmatprep.subr.msk.bf16.mxu1 %vm689_vm2, %v718_v8 }
  0x54   : > { %693 = vmatpush1.bf16.msk.msra.mxu0 %vm689_vm2, %v691_v11 }
  0x55   : > { %723 = vmatpush1.bf16.msk.msra.mxu1 %vm689_vm2, %v721_v12 }
  0x57   : > { %657 = vmatmul.mubr.msk.f32.vlgmr.msra.gmra.mrb[0].mxu0 %vm371_vm3, %v314_v13 }
  0x58   : > { %660 = vmatmul.mubr.msk.f32.vlgmr.msra.gmra.mrb[0].mxu1 %vm371_vm3, %v314_v13 }
 0x12a   : > { %v454_v14 = vpop.f32.mrb[0].mxu0 }
 0x12b   : > { %530 = vst [vmem:[%s308_s9] sm:$0xff] %v454_v14  ;;  %v539_v15 = vmul.f32 %v454_v14, %v454_v14  ;;  %v456_v16 = vpop.f32.mrb[1].mxu0  ;;  %v525_v17 = vpop.f32.mrb[0].mxu1 }
 0x12c   : > { %531 = vst [vmem:[%s308_s9 + $0x8] sm:$0xff] %v456_v16  ;;  %v534_v18 = vadd.f32 %v456_v16, %v454_v14  ;;  %v540_v19 = vmul.f32 %v456_v16, %v456_v16  ;;  %v541_v20 = vmul.f32 %v525_v17, %v525_v17  ;;  %v527_v21 = vpop.f32.mrb[1].mxu1  ;;  %532 = vst [vmem:[%s308_s9 + $0x10] sm:$0xff] %v525_v17 }
 0x12d   : > { %533 = vst [vmem:[%s308_s9 + $0x18] sm:$0xff] %v527_v21  ;;  %v542_v24 = vmul.f32 %v527_v21, %v527_v21 }
 0x12e   : > { %v543_v22 = vadd.f32 %v540_v19, %v539_v15  ;;  %v535_v23 = vadd.f32 %v534_v18, %v525_v17 }
 0x130   : > { %v536_v25 = vadd.f32 %v535_v23, %v527_v21  ;;  %v544_v26 = vadd.f32 %v543_v22, %v541_v20 }
 0x132   : > { %537 = vadd.xlane.f32.xlu0 %v536_v25  ;;  %v545_v27 = vadd.f32 %v544_v26, %v542_v24 }
 0x136   : > { %546 = vadd.xlane.f32.xlu0 %v545_v27 }
 0x1bf   : > { %v538_v28 = vpop.xlane.xlu0 %537 }
 0x1c3   : > { %v547_v29 = vpop.xlane.xlu0 %546 }
 0x1c4   : > { %v549_v30 = vsel %vm548_vm4, %v538_v28, %v547_v29 }
 0x1c5   : > { %551 = vst.msk [vmem:[%s313_s14] sm:$0xff] %vm550_vm5, %v549_v30 }
 0x1c6 PF: > { %p11_p10 = scmp.ge.s32.totalorder %s817_s16, 4   ;;  %s1037_s12 = smov %s770_s13 }
 0x1c7   : > { %s1038_s13 = smov %s826_s19  ;;  %s1039_s14 = smov %s817_s16 }
 0x1c8   :  { %13 = sbr.rel (!%p11_p10) target bundleno = 2 (0x2), region = 98 }

// kernel: luconv_pallas.3
= control target key start
LH: loop header
LB: loop body
LE: loop exit
PB: predicated region body
PF: predicated region fallthrough
CT: control target
= control target key end

     0   :  { %s312_s12 = smov 0   ;;  %s335_s0 = inlined_call_operand.vmem [shape: f32[8,1], index: 0, kind: input, shape index: {}]   ;;  %s336_s1 = inlined_call_operand.vmem [shape: f32[8,1], index: 1, kind: input, shape index: {}]   ;;  %s337_s2 = inlined_call_operand.vmem [shape: f32[8,1024], index: 2, kind: input, shape index: {}]   ;;  %s338_s3 = inlined_call_operand.vmem [shape: f32[8,1024], index: 3, kind: output, shape index: {}]  }
   0x1 LB: > { %s262_s13 = sadd.s32 4294967295, %s289_s12   ;;  %p266_p0 = scmp.ge.s32.totalorder %s289_s12, 1  ;;  %s289_s12 = sphi %s312_s12, %s13_s12  }
   0x2   : > { %p138_p1 = scmp.lt.s32.totalorder %s289_s12, 3 }
   0x4   : > { %p139_p2 = pnand %p266_p0, %p138_p1 }
   0x5   : > { %v178_v0 = vld [vmem:[%s335_s0] sm:$0xff] (!%p139_p2)  ;;  %v291_v1 = vmov (!%p139_p2), 0   ;;  %s267_s18 = sshll.u32 (!%p139_p2), %s262_s13, 2 }
   0x6   : > { %142 = sbr.rel (%p139_p2) target bundleno = 145 (0x91), region = 32  ;;  %282 = vset.pattern.permute.xlu0 (!%p139_p2), %v291_v1  ;;  %v188_v2 = vld [vmem:[%s336_s1] sm:$0xff] (!%p139_p2)  ;;  %p163_p3 = scmp.lt.s32.totalorder (!%p139_p2), %s267_s18, 7 }
   0x7   : > { %181 = vperm.xlu0 (!%p139_p2), %282, %v178_v0  }
   0xb   : > { %191 = vperm.xlu0 (!%p139_p2), %282, %v188_v2  }
   0xd   : > { %s340_s18 = smov (!%p163_p3, %s267_s18), 7 }
   0xe   : > { %s268_s19 = sshll.u32 %s340_s18, 3 }
   0xf   : > { %s166_s22 = scalar_lea.vmem %s337_s2, %s268_s19  ;;  %s172_s25 = scalar_lea.vmem %s338_s3, %s268_s19 }
  0x10   : > { %v174_v4 = vld [vmem:[%s166_s22] sm:$0xff]  ;;  %v175_v5 = vld [vmem:[%s166_s22 + $0x8] sm:$0xff]  ;;  %v176_v6 = vld [vmem:[%s166_s22 + $0x10] sm:$0xff] }
  0x11   : > { %v177_v7 = vld [vmem:[%s166_s22 + $0x18] sm:$0xff] }
  0x86   : > { %v182_v3 = vpop.permute.xlu0 %181 }
  0x87   : > { %v184_v8 = vmul.f32 %v182_v3, %v174_v4  ;;  %v185_v9 = vmul.f32 %v182_v3, %v175_v5  ;;  %v186_v10 = vmul.f32 %v182_v3, %v176_v6  ;;  %v187_v12 = vmul.f32 %v182_v3, %v177_v7 }
  0x8a   : > { %v192_v11 = vpop.permute.xlu0 %191 }
  0x8b   : > { %v194_v13 = vadd.f32 %v192_v11, %v184_v8  ;;  %v195_v14 = vadd.f32 %v192_v11, %v185_v9  ;;  %v196_v15 = vadd.f32 %v192_v11, %v186_v10  ;;  %v197_v16 = vadd.f32 %v192_v11, %v187_v12 }
  0x8d   : > { %v198_v17 = vmax.f32 %v194_v13, 0.0  ;;  %v199_v18 = vmax.f32 %v195_v14, 0.0  ;;  %v200_v19 = vmax.f32 %v196_v15, 0.0  ;;  %v201_v20 = vmax.f32 %v197_v16, 0.0 }
  0x8f   : > { %202 = vst [vmem:[%s172_s25] sm:$0xff] %v198_v17  ;;  %203 = vst [vmem:[%s172_s25 + $0x8] sm:$0xff] %v199_v18 }
  0x90   : > { %204 = vst [vmem:[%s172_s25 + $0x10] sm:$0xff] %v200_v19  ;;  %205 = vst [vmem:[%s172_s25 + $0x18] sm:$0xff] %v201_v20 }
  0x91 PF: > { %s13_s12 = sadd.s32 1, %s289_s12  }
  0x92   : > { %p10_p4 = scmp.ge.s32.totalorder %s13_s12, 4  }
  0x94   :  { %12 = sbr.rel (!%p10_p4) target bundleno = 1 (0x1), region = 62 }

</bundles_post_ra>
